<compile_context>
chip_gen: v7x
topology: tpu7x:2x2x1
jax: 0.10.0
libtpu: 0.0.40
codegen_flags: <defaults>
</compile_context>

<pallas_src>
import functools

import jax
import jax.numpy as jnp
from jax.experimental import pallas as pl
from jax.experimental.pallas import tpu as pltpu


def _gather_rows_kernel(tile_n, ids_ref, bias_ref, table_hbm, out_ref,
                        rows_vmem, sems):
    """Row gather from an HBM table + bias add.

    ids_ref  : SMEM (N_pad,) int32  token ids (scalar-prefetched)
    bias_ref : VMEM (1, C_pad) f32  classifier bias (constant block, loaded once)
    table_hbm: HBM  (V, C_pad) f32  fused (Embedding @ W^T) table, never in VMEM
    out_ref  : VMEM (tile_n, C_pad) f32  logits tile
    rows_vmem: VMEM scratch (tile_n, C_pad) f32
    sems     : DMA semaphores (tile_n,)
    """
    i = pl.program_id(0)
    base = i * tile_n

    # Read all SMEM scalars and launch all row DMAs before any wait.
    copies = []
    for j in range(tile_n):
        row_id = ids_ref[base + j]
        cp = pltpu.make_async_copy(
            table_hbm.at[pl.ds(row_id, 1), :],
            rows_vmem.at[pl.ds(j, 1), :],
            sems.at[j],
        )
        cp.start()
        copies.append(cp)
    for cp in copies:
        cp.wait()

    # Bias is a (1, C_pad) resident block; broadcast-add folded into the writeback.
    out_ref[...] = rows_vmem[...] + bias_ref[...]


def _round_up(x, m):
    return (x + m - 1) // m * m


def torch_model_forward(token_ids, emb_table, w_classify, b_classify, *, tile_n=8):
    """Forward pass of TorchModel (non-bert path, inference, no CRF).

    token_ids : (B, S) int32
    emb_table : (V, H) float32   (row 0 = padding_idx row)
    w_classify: (C, H) float32   (PyTorch nn.Linear weight layout)
    b_classify: (C,)   float32
    returns   : (B, S, C) float32 logits

    tile_n: rows of the flattened (B*S) token axis handled per grid step.
            8 for the toy shapes here; use 128-512 for production-sized N.
    """
    B, S = token_ids.shape
    V, H = emb_table.shape
    C = w_classify.shape[0]
    N = B * S

    lane = 128
    c_pad = _round_up(max(C, lane), lane)          # lane-dense output width
    tn = max(8, _round_up(min(tile_n, N), 8))      # sublane-aligned row tile
    n_pad = _round_up(N, tn)

    # Fuse Embedding + Linear:  logits = (E @ W^T)[ids] + b   (exact: gather
    # commutes with the row-wise matmul; dropout is identity in eval mode).
    # Weights-only computation -> amortized across forward calls.
    fused = jnp.dot(emb_table, w_classify.T, preferred_element_type=jnp.float32)
    fused = jnp.pad(fused, ((0, 0), (0, c_pad - C)))            # (V, c_pad)
    bias = jnp.pad(b_classify, (0, c_pad - C)).reshape(1, c_pad)

    ids = token_ids.reshape(-1).astype(jnp.int32)
    ids = jnp.pad(ids, (0, n_pad - N))             # pad with id 0 (padding row)

    kernel = functools.partial(_gather_rows_kernel, tn)

    out = pl.pallas_call(
        kernel,
        out_shape=jax.ShapeDtypeStruct((n_pad, c_pad), jnp.float32),
        grid_spec=pltpu.PrefetchScalarGridSpec(
            num_scalar_prefetch=1,                 # ids -> SMEM
            grid=(n_pad // tn,),
            in_specs=[
                # bias: full array == block, constant index -> loaded once, resident
                pl.BlockSpec((1, c_pad), lambda i, ids: (0, 0)),
                # fused table: stays in HBM, gathered row-by-row via manual DMA
                pl.BlockSpec(memory_space=pl.ANY),
            ],
            out_specs=pl.BlockSpec((tn, c_pad), lambda i, ids: (i, 0)),
            scratch_shapes=[
                pltpu.VMEM((tn, c_pad), jnp.float32),
                pltpu.SemaphoreType.DMA((tn,)),
            ],
        ),
        compiler_params=pltpu.CompilerParams(
            # rows are independent -> shard across the 2 TensorCores on v7x
            dimension_semantics=("parallel",),
        ),
    )(ids, bias, fused)

    return out[:N, :C].reshape(B, S, C)


def _reference(token_ids, emb_table, w_classify, b_classify):
    x = emb_table[token_ids]                                   # (B, S, H)
    return jnp.einsum("bsh,ch->bsc", x, w_classify) + b_classify


# TODO(synk): bert branch, (unused) LSTM layer, CRF loss/decode, CrossEntropyLoss
# training path and training-mode dropout are not implemented (inference, non-bert
# forward only).

if __name__ == "__main__":
    # config (small, consistent with the module's __init__):
    vocab_size = 31           # config['vocab_size'] -> embedding has vocab_size+1 rows
    hidden_size = 32          # config['hidden_size']
    class_num = 8             # config['class_num']
    batch, seq = 2, 8         # seq <= config['max_length']

    V = vocab_size + 1

    key = jax.random.PRNGKey(0)
    k_ids, k_emb, k_w, k_b = jax.random.split(key, 4)

    # nn.Embedding: N(0,1) init, padding_idx=0 row zeroed.
    emb_table = jax.random.normal(k_emb, (V, hidden_size), dtype=jnp.float32)
    emb_table = emb_table.at[0].set(0.0)

    # nn.Linear(hidden_size, class_num): U(-1/sqrt(H), 1/sqrt(H)).
    bound = 1.0 / (hidden_size ** 0.5)
    w_classify = jax.random.uniform(
        k_w, (class_num, hidden_size), minval=-bound, maxval=bound, dtype=jnp.float32)
    b_classify = jax.random.uniform(
        k_b, (class_num,), minval=-bound, maxval=bound, dtype=jnp.float32)

    token_ids = jax.random.randint(k_ids, (batch, seq), 0, V, dtype=jnp.int32)

    predict = torch_model_forward(token_ids, emb_table, w_classify, b_classify)
    predict = jax.block_until_ready(predict)

    ref = _reference(token_ids, emb_table, w_classify, b_classify)
    assert predict.shape == (batch, seq, class_num)
    assert jnp.allclose(predict, ref, atol=1e-5, rtol=1e-5)

    print("KERNEL_OK")
</pallas_src>

<mosaic_0001>
module attributes {stable_mosaic.version = 11 : i64} {
  func.func @_gather_rows_kernel(%arg0: i32, %arg1: memref<16xi32, #tpu.memory_space<smem>>, %arg2: memref<1x128xf32, #tpu.memory_space<vmem>>, %arg3: memref<32x128xf32, #tpu.memory_space<any>>, %arg4: memref<8x128xf32, #tpu.memory_space<vmem>>, %arg5: memref<8x128xf32, #tpu.memory_space<vmem>>, %arg6: memref<8x!tpu.dma_semaphore, #tpu.memory_space<semaphore_mem>>) attributes {dimension_semantics = [#tpu.dimension_semantics<parallel>], iteration_bounds = array<i64: 2>, scalar_prefetch = 1 : i64, scratch_operands = 2 : i64, tpu.core_type = #tpu.core_type<tc>, window_params = [{pipeline_mode = #tpu.pipeline_mode<synchronous>, transform_indices = @transform_0, window_bounds = array<i64: 1, 128>}, {}, {transform_indices = @transform_2, window_bounds = array<i64: 8, 128>}]} {
    %c8_i32 = arith.constant 8 : i32
    %0 = arith.muli %arg0, %c8_i32 : i32
    %c0_i32 = arith.constant 0 : i32
    %1 = arith.addi %0, %c0_i32 : i32
    %2 = arith.index_cast %1 : i32 to index
    %3 = memref.load %arg1[%2] : memref<16xi32, #tpu.memory_space<smem>>
    %c0_i32_0 = arith.constant 0 : i32
    %c0_i32_1 = arith.constant 0 : i32
    %4 = tpu.memref_slice %arg3[%3, %c0_i32_1] : memref<32x128xf32, #tpu.memory_space<any>> -> memref<1x128xf32, #tpu.memory_space<any>>
    %c0_i32_2 = arith.constant 0 : i32
    %c0_i32_3 = arith.constant 0 : i32
    %5 = tpu.memref_slice %arg5[%c0_i32_2, %c0_i32_3] : memref<8x128xf32, #tpu.memory_space<vmem>> -> memref<1x128xf32, #tpu.memory_space<vmem>>
    %6 = tpu.memref_slice %arg6[%c0_i32_0] : memref<8x!tpu.dma_semaphore, #tpu.memory_space<semaphore_mem>> -> memref<1x!tpu.dma_semaphore, #tpu.memory_space<semaphore_mem>>
    %7 = tpu.memref_squeeze %6 : memref<1x!tpu.dma_semaphore, #tpu.memory_space<semaphore_mem>> -> memref<!tpu.dma_semaphore, #tpu.memory_space<semaphore_mem>>
    tpu.enqueue_dma source(%4 : memref<1x128xf32, #tpu.memory_space<any>>) target(%5 : memref<1x128xf32, #tpu.memory_space<vmem>>) target_semaphore(%7 : memref<!tpu.dma_semaphore, #tpu.memory_space<semaphore_mem>>)
    %c1_i32 = arith.constant 1 : i32
    %8 = arith.addi %0, %c1_i32 : i32
    %9 = arith.index_cast %8 : i32 to index
    %10 = memref.load %arg1[%9] : memref<16xi32, #tpu.memory_space<smem>>
    %c1_i32_4 = arith.constant 1 : i32
    %c0_i32_5 = arith.constant 0 : i32
    %11 = tpu.memref_slice %arg3[%10, %c0_i32_5] : memref<32x128xf32, #tpu.memory_space<any>> -> memref<1x128xf32, #tpu.memory_space<any>>
    %c1_i32_6 = arith.constant 1 : i32
    %c0_i32_7 = arith.constant 0 : i32
    %12 = tpu.memref_slice %arg5[%c1_i32_6, %c0_i32_7] : memref<8x128xf32, #tpu.memory_space<vmem>> -> memref<1x128xf32, #tpu.memory_space<vmem>>
    %13 = tpu.memref_slice %arg6[%c1_i32_4] : memref<8x!tpu.dma_semaphore, #tpu.memory_space<semaphore_mem>> -> memref<1x!tpu.dma_semaphore, #tpu.memory_space<semaphore_mem>>
    %14 = tpu.memref_squeeze %13 : memref<1x!tpu.dma_semaphore, #tpu.memory_space<semaphore_mem>> -> memref<!tpu.dma_semaphore, #tpu.memory_space<semaphore_mem>>
    tpu.enqueue_dma source(%11 : memref<1x128xf32, #tpu.memory_space<any>>) target(%12 : memref<1x128xf32, #tpu.memory_space<vmem>>) target_semaphore(%14 : memref<!tpu.dma_semaphore, #tpu.memory_space<semaphore_mem>>)
    %c2_i32 = arith.constant 2 : i32
    %15 = arith.addi %0, %c2_i32 : i32
    %16 = arith.index_cast %15 : i32 to index
    %17 = memref.load %arg1[%16] : memref<16xi32, #tpu.memory_space<smem>>
    %c2_i32_8 = arith.constant 2 : i32
    %c0_i32_9 = arith.constant 0 : i32
    %18 = tpu.memref_slice %arg3[%17, %c0_i32_9] : memref<32x128xf32, #tpu.memory_space<any>> -> memref<1x128xf32, #tpu.memory_space<any>>
    %c2_i32_10 = arith.constant 2 : i32
    %c0_i32_11 = arith.constant 0 : i32
    %19 = tpu.memref_slice %arg5[%c2_i32_10, %c0_i32_11] : memref<8x128xf32, #tpu.memory_space<vmem>> -> memref<1x128xf32, #tpu.memory_space<vmem>>
    %20 = tpu.memref_slice %arg6[%c2_i32_8] : memref<8x!tpu.dma_semaphore, #tpu.memory_space<semaphore_mem>> -> memref<1x!tpu.dma_semaphore, #tpu.memory_space<semaphore_mem>>
    %21 = tpu.memref_squeeze %20 : memref<1x!tpu.dma_semaphore, #tpu.memory_space<semaphore_mem>> -> memref<!tpu.dma_semaphore, #tpu.memory_space<semaphore_mem>>
    tpu.enqueue_dma source(%18 : memref<1x128xf32, #tpu.memory_space<any>>) target(%19 : memref<1x128xf32, #tpu.memory_space<vmem>>) target_semaphore(%21 : memref<!tpu.dma_semaphore, #tpu.memory_space<semaphore_mem>>)
    %c3_i32 = arith.constant 3 : i32
    %22 = arith.addi %0, %c3_i32 : i32
    %23 = arith.index_cast %22 : i32 to index
    %24 = memref.load %arg1[%23] : memref<16xi32, #tpu.memory_space<smem>>
    %c3_i32_12 = arith.constant 3 : i32
    %c0_i32_13 = arith.constant 0 : i32
    %25 = tpu.memref_slice %arg3[%24, %c0_i32_13] : memref<32x128xf32, #tpu.memory_space<any>> -> memref<1x128xf32, #tpu.memory_space<any>>
    %c3_i32_14 = arith.constant 3 : i32
    %c0_i32_15 = arith.constant 0 : i32
    %26 = tpu.memref_slice %arg5[%c3_i32_14, %c0_i32_15] : memref<8x128xf32, #tpu.memory_space<vmem>> -> memref<1x128xf32, #tpu.memory_space<vmem>>
    %27 = tpu.memref_slice %arg6[%c3_i32_12] : memref<8x!tpu.dma_semaphore, #tpu.memory_space<semaphore_mem>> -> memref<1x!tpu.dma_semaphore, #tpu.memory_space<semaphore_mem>>
    %28 = tpu.memref_squeeze %27 : memref<1x!tpu.dma_semaphore, #tpu.memory_space<semaphore_mem>> -> memref<!tpu.dma_semaphore, #tpu.memory_space<semaphore_mem>>
    tpu.enqueue_dma source(%25 : memref<1x128xf32, #tpu.memory_space<any>>) target(%26 : memref<1x128xf32, #tpu.memory_space<vmem>>) target_semaphore(%28 : memref<!tpu.dma_semaphore, #tpu.memory_space<semaphore_mem>>)
    %c4_i32 = arith.constant 4 : i32
    %29 = arith.addi %0, %c4_i32 : i32
    %30 = arith.index_cast %29 : i32 to index
    %31 = memref.load %arg1[%30] : memref<16xi32, #tpu.memory_space<smem>>
    %c4_i32_16 = arith.constant 4 : i32
    %c0_i32_17 = arith.constant 0 : i32
    %32 = tpu.memref_slice %arg3[%31, %c0_i32_17] : memref<32x128xf32, #tpu.memory_space<any>> -> memref<1x128xf32, #tpu.memory_space<any>>
    %c4_i32_18 = arith.constant 4 : i32
    %c0_i32_19 = arith.constant 0 : i32
    %33 = tpu.memref_slice %arg5[%c4_i32_18, %c0_i32_19] : memref<8x128xf32, #tpu.memory_space<vmem>> -> memref<1x128xf32, #tpu.memory_space<vmem>>
    %34 = tpu.memref_slice %arg6[%c4_i32_16] : memref<8x!tpu.dma_semaphore, #tpu.memory_space<semaphore_mem>> -> memref<1x!tpu.dma_semaphore, #tpu.memory_space<semaphore_mem>>
    %35 = tpu.memref_squeeze %34 : memref<1x!tpu.dma_semaphore, #tpu.memory_space<semaphore_mem>> -> memref<!tpu.dma_semaphore, #tpu.memory_space<semaphore_mem>>
    tpu.enqueue_dma source(%32 : memref<1x128xf32, #tpu.memory_space<any>>) target(%33 : memref<1x128xf32, #tpu.memory_space<vmem>>) target_semaphore(%35 : memref<!tpu.dma_semaphore, #tpu.memory_space<semaphore_mem>>)
    %c5_i32 = arith.constant 5 : i32
    %36 = arith.addi %0, %c5_i32 : i32
    %37 = arith.index_cast %36 : i32 to index
    %38 = memref.load %arg1[%37] : memref<16xi32, #tpu.memory_space<smem>>
    %c5_i32_20 = arith.constant 5 : i32
    %c0_i32_21 = arith.constant 0 : i32
    %39 = tpu.memref_slice %arg3[%38, %c0_i32_21] : memref<32x128xf32, #tpu.memory_space<any>> -> memref<1x128xf32, #tpu.memory_space<any>>
    %c5_i32_22 = arith.constant 5 : i32
    %c0_i32_23 = arith.constant 0 : i32
    %40 = tpu.memref_slice %arg5[%c5_i32_22, %c0_i32_23] : memref<8x128xf32, #tpu.memory_space<vmem>> -> memref<1x128xf32, #tpu.memory_space<vmem>>
    %41 = tpu.memref_slice %arg6[%c5_i32_20] : memref<8x!tpu.dma_semaphore, #tpu.memory_space<semaphore_mem>> -> memref<1x!tpu.dma_semaphore, #tpu.memory_space<semaphore_mem>>
    %42 = tpu.memref_squeeze %41 : memref<1x!tpu.dma_semaphore, #tpu.memory_space<semaphore_mem>> -> memref<!tpu.dma_semaphore, #tpu.memory_space<semaphore_mem>>
    tpu.enqueue_dma source(%39 : memref<1x128xf32, #tpu.memory_space<any>>) target(%40 : memref<1x128xf32, #tpu.memory_space<vmem>>) target_semaphore(%42 : memref<!tpu.dma_semaphore, #tpu.memory_space<semaphore_mem>>)
    %c6_i32 = arith.constant 6 : i32
    %43 = arith.addi %0, %c6_i32 : i32
    %44 = arith.index_cast %43 : i32 to index
    %45 = memref.load %arg1[%44] : memref<16xi32, #tpu.memory_space<smem>>
    %c6_i32_24 = arith.constant 6 : i32
    %c0_i32_25 = arith.constant 0 : i32
    %46 = tpu.memref_slice %arg3[%45, %c0_i32_25] : memref<32x128xf32, #tpu.memory_space<any>> -> memref<1x128xf32, #tpu.memory_space<any>>
    %c6_i32_26 = arith.constant 6 : i32
    %c0_i32_27 = arith.constant 0 : i32
    %47 = tpu.memref_slice %arg5[%c6_i32_26, %c0_i32_27] : memref<8x128xf32, #tpu.memory_space<vmem>> -> memref<1x128xf32, #tpu.memory_space<vmem>>
    %48 = tpu.memref_slice %arg6[%c6_i32_24] : memref<8x!tpu.dma_semaphore, #tpu.memory_space<semaphore_mem>> -> memref<1x!tpu.dma_semaphore, #tpu.memory_space<semaphore_mem>>
    %49 = tpu.memref_squeeze %48 : memref<1x!tpu.dma_semaphore, #tpu.memory_space<semaphore_mem>> -> memref<!tpu.dma_semaphore, #tpu.memory_space<semaphore_mem>>
    tpu.enqueue_dma source(%46 : memref<1x128xf32, #tpu.memory_space<any>>) target(%47 : memref<1x128xf32, #tpu.memory_space<vmem>>) target_semaphore(%49 : memref<!tpu.dma_semaphore, #tpu.memory_space<semaphore_mem>>)
    %c7_i32 = arith.constant 7 : i32
    %50 = arith.addi %0, %c7_i32 : i32
    %51 = arith.index_cast %50 : i32 to index
    %52 = memref.load %arg1[%51] : memref<16xi32, #tpu.memory_space<smem>>
    %c7_i32_28 = arith.constant 7 : i32
    %c0_i32_29 = arith.constant 0 : i32
    %53 = tpu.memref_slice %arg3[%52, %c0_i32_29] : memref<32x128xf32, #tpu.memory_space<any>> -> memref<1x128xf32, #tpu.memory_space<any>>
    %c7_i32_30 = arith.constant 7 : i32
    %c0_i32_31 = arith.constant 0 : i32
    %54 = tpu.memref_slice %arg5[%c7_i32_30, %c0_i32_31] : memref<8x128xf32, #tpu.memory_space<vmem>> -> memref<1x128xf32, #tpu.memory_space<vmem>>
    %55 = tpu.memref_slice %arg6[%c7_i32_28] : memref<8x!tpu.dma_semaphore, #tpu.memory_space<semaphore_mem>> -> memref<1x!tpu.dma_semaphore, #tpu.memory_space<semaphore_mem>>
    %56 = tpu.memref_squeeze %55 : memref<1x!tpu.dma_semaphore, #tpu.memory_space<semaphore_mem>> -> memref<!tpu.dma_semaphore, #tpu.memory_space<semaphore_mem>>
    tpu.enqueue_dma source(%53 : memref<1x128xf32, #tpu.memory_space<any>>) target(%54 : memref<1x128xf32, #tpu.memory_space<vmem>>) target_semaphore(%56 : memref<!tpu.dma_semaphore, #tpu.memory_space<semaphore_mem>>)
    %c0_i32_32 = arith.constant 0 : i32
    %c0_i32_33 = arith.constant 0 : i32
    %57 = tpu.memref_slice %arg3[%3, %c0_i32_33] : memref<32x128xf32, #tpu.memory_space<any>> -> memref<1x128xf32, #tpu.memory_space<any>>
    %c0_i32_34 = arith.constant 0 : i32
    %c0_i32_35 = arith.constant 0 : i32
    %58 = tpu.memref_slice %arg5[%c0_i32_34, %c0_i32_35] : memref<8x128xf32, #tpu.memory_space<vmem>> -> memref<1x128xf32, #tpu.memory_space<vmem>>
    %59 = tpu.memref_slice %arg6[%c0_i32_32] : memref<8x!tpu.dma_semaphore, #tpu.memory_space<semaphore_mem>> -> memref<1x!tpu.dma_semaphore, #tpu.memory_space<semaphore_mem>>
    %60 = tpu.memref_squeeze %59 : memref<1x!tpu.dma_semaphore, #tpu.memory_space<semaphore_mem>> -> memref<!tpu.dma_semaphore, #tpu.memory_space<semaphore_mem>>
    tpu.wait_dma2 semaphore(%60 : memref<!tpu.dma_semaphore, #tpu.memory_space<semaphore_mem>>) src(%57 : memref<1x128xf32, #tpu.memory_space<any>>) dst(%58 : memref<1x128xf32, #tpu.memory_space<vmem>>)
    %c1_i32_36 = arith.constant 1 : i32
    %c0_i32_37 = arith.constant 0 : i32
    %61 = tpu.memref_slice %arg3[%10, %c0_i32_37] : memref<32x128xf32, #tpu.memory_space<any>> -> memref<1x128xf32, #tpu.memory_space<any>>
    %c1_i32_38 = arith.constant 1 : i32
    %c0_i32_39 = arith.constant 0 : i32
    %62 = tpu.memref_slice %arg5[%c1_i32_38, %c0_i32_39] : memref<8x128xf32, #tpu.memory_space<vmem>> -> memref<1x128xf32, #tpu.memory_space<vmem>>
    %63 = tpu.memref_slice %arg6[%c1_i32_36] : memref<8x!tpu.dma_semaphore, #tpu.memory_space<semaphore_mem>> -> memref<1x!tpu.dma_semaphore, #tpu.memory_space<semaphore_mem>>
    %64 = tpu.memref_squeeze %63 : memref<1x!tpu.dma_semaphore, #tpu.memory_space<semaphore_mem>> -> memref<!tpu.dma_semaphore, #tpu.memory_space<semaphore_mem>>
    tpu.wait_dma2 semaphore(%64 : memref<!tpu.dma_semaphore, #tpu.memory_space<semaphore_mem>>) src(%61 : memref<1x128xf32, #tpu.memory_space<any>>) dst(%62 : memref<1x128xf32, #tpu.memory_space<vmem>>)
    %c2_i32_40 = arith.constant 2 : i32
    %c0_i32_41 = arith.constant 0 : i32
    %65 = tpu.memref_slice %arg3[%17, %c0_i32_41] : memref<32x128xf32, #tpu.memory_space<any>> -> memref<1x128xf32, #tpu.memory_space<any>>
    %c2_i32_42 = arith.constant 2 : i32
    %c0_i32_43 = arith.constant 0 : i32
    %66 = tpu.memref_slice %arg5[%c2_i32_42, %c0_i32_43] : memref<8x128xf32, #tpu.memory_space<vmem>> -> memref<1x128xf32, #tpu.memory_space<vmem>>
    %67 = tpu.memref_slice %arg6[%c2_i32_40] : memref<8x!tpu.dma_semaphore, #tpu.memory_space<semaphore_mem>> -> memref<1x!tpu.dma_semaphore, #tpu.memory_space<semaphore_mem>>
    %68 = tpu.memref_squeeze %67 : memref<1x!tpu.dma_semaphore, #tpu.memory_space<semaphore_mem>> -> memref<!tpu.dma_semaphore, #tpu.memory_space<semaphore_mem>>
    tpu.wait_dma2 semaphore(%68 : memref<!tpu.dma_semaphore, #tpu.memory_space<semaphore_mem>>) src(%65 : memref<1x128xf32, #tpu.memory_space<any>>) dst(%66 : memref<1x128xf32, #tpu.memory_space<vmem>>)
    %c3_i32_44 = arith.constant 3 : i32
    %c0_i32_45 = arith.constant 0 : i32
    %69 = tpu.memref_slice %arg3[%24, %c0_i32_45] : memref<32x128xf32, #tpu.memory_space<any>> -> memref<1x128xf32, #tpu.memory_space<any>>
    %c3_i32_46 = arith.constant 3 : i32
    %c0_i32_47 = arith.constant 0 : i32
    %70 = tpu.memref_slice %arg5[%c3_i32_46, %c0_i32_47] : memref<8x128xf32, #tpu.memory_space<vmem>> -> memref<1x128xf32, #tpu.memory_space<vmem>>
    %71 = tpu.memref_slice %arg6[%c3_i32_44] : memref<8x!tpu.dma_semaphore, #tpu.memory_space<semaphore_mem>> -> memref<1x!tpu.dma_semaphore, #tpu.memory_space<semaphore_mem>>
    %72 = tpu.memref_squeeze %71 : memref<1x!tpu.dma_semaphore, #tpu.memory_space<semaphore_mem>> -> memref<!tpu.dma_semaphore, #tpu.memory_space<semaphore_mem>>
    tpu.wait_dma2 semaphore(%72 : memref<!tpu.dma_semaphore, #tpu.memory_space<semaphore_mem>>) src(%69 : memref<1x128xf32, #tpu.memory_space<any>>) dst(%70 : memref<1x128xf32, #tpu.memory_space<vmem>>)
    %c4_i32_48 = arith.constant 4 : i32
    %c0_i32_49 = arith.constant 0 : i32
    %73 = tpu.memref_slice %arg3[%31, %c0_i32_49] : memref<32x128xf32, #tpu.memory_space<any>> -> memref<1x128xf32, #tpu.memory_space<any>>
    %c4_i32_50 = arith.constant 4 : i32
    %c0_i32_51 = arith.constant 0 : i32
    %74 = tpu.memref_slice %arg5[%c4_i32_50, %c0_i32_51] : memref<8x128xf32, #tpu.memory_space<vmem>> -> memref<1x128xf32, #tpu.memory_space<vmem>>
    %75 = tpu.memref_slice %arg6[%c4_i32_48] : memref<8x!tpu.dma_semaphore, #tpu.memory_space<semaphore_mem>> -> memref<1x!tpu.dma_semaphore, #tpu.memory_space<semaphore_mem>>
    %76 = tpu.memref_squeeze %75 : memref<1x!tpu.dma_semaphore, #tpu.memory_space<semaphore_mem>> -> memref<!tpu.dma_semaphore, #tpu.memory_space<semaphore_mem>>
    tpu.wait_dma2 semaphore(%76 : memref<!tpu.dma_semaphore, #tpu.memory_space<semaphore_mem>>) src(%73 : memref<1x128xf32, #tpu.memory_space<any>>) dst(%74 : memref<1x128xf32, #tpu.memory_space<vmem>>)
    %c5_i32_52 = arith.constant 5 : i32
    %c0_i32_53 = arith.constant 0 : i32
    %77 = tpu.memref_slice %arg3[%38, %c0_i32_53] : memref<32x128xf32, #tpu.memory_space<any>> -> memref<1x128xf32, #tpu.memory_space<any>>
    %c5_i32_54 = arith.constant 5 : i32
    %c0_i32_55 = arith.constant 0 : i32
    %78 = tpu.memref_slice %arg5[%c5_i32_54, %c0_i32_55] : memref<8x128xf32, #tpu.memory_space<vmem>> -> memref<1x128xf32, #tpu.memory_space<vmem>>
    %79 = tpu.memref_slice %arg6[%c5_i32_52] : memref<8x!tpu.dma_semaphore, #tpu.memory_space<semaphore_mem>> -> memref<1x!tpu.dma_semaphore, #tpu.memory_space<semaphore_mem>>
    %80 = tpu.memref_squeeze %79 : memref<1x!tpu.dma_semaphore, #tpu.memory_space<semaphore_mem>> -> memref<!tpu.dma_semaphore, #tpu.memory_space<semaphore_mem>>
    tpu.wait_dma2 semaphore(%80 : memref<!tpu.dma_semaphore, #tpu.memory_space<semaphore_mem>>) src(%77 : memref<1x128xf32, #tpu.memory_space<any>>) dst(%78 : memref<1x128xf32, #tpu.memory_space<vmem>>)
    %c6_i32_56 = arith.constant 6 : i32
    %c0_i32_57 = arith.constant 0 : i32
    %81 = tpu.memref_slice %arg3[%45, %c0_i32_57] : memref<32x128xf32, #tpu.memory_space<any>> -> memref<1x128xf32, #tpu.memory_space<any>>
    %c6_i32_58 = arith.constant 6 : i32
    %c0_i32_59 = arith.constant 0 : i32
    %82 = tpu.memref_slice %arg5[%c6_i32_58, %c0_i32_59] : memref<8x128xf32, #tpu.memory_space<vmem>> -> memref<1x128xf32, #tpu.memory_space<vmem>>
    %83 = tpu.memref_slice %arg6[%c6_i32_56] : memref<8x!tpu.dma_semaphore, #tpu.memory_space<semaphore_mem>> -> memref<1x!tpu.dma_semaphore, #tpu.memory_space<semaphore_mem>>
    %84 = tpu.memref_squeeze %83 : memref<1x!tpu.dma_semaphore, #tpu.memory_space<semaphore_mem>> -> memref<!tpu.dma_semaphore, #tpu.memory_space<semaphore_mem>>
    tpu.wait_dma2 semaphore(%84 : memref<!tpu.dma_semaphore, #tpu.memory_space<semaphore_mem>>) src(%81 : memref<1x128xf32, #tpu.memory_space<any>>) dst(%82 : memref<1x128xf32, #tpu.memory_space<vmem>>)
    %c7_i32_60 = arith.constant 7 : i32
    %c0_i32_61 = arith.constant 0 : i32
    %85 = tpu.memref_slice %arg3[%52, %c0_i32_61] : memref<32x128xf32, #tpu.memory_space<any>> -> memref<1x128xf32, #tpu.memory_space<any>>
    %c7_i32_62 = arith.constant 7 : i32
    %c0_i32_63 = arith.constant 0 : i32
    %86 = tpu.memref_slice %arg5[%c7_i32_62, %c0_i32_63] : memref<8x128xf32, #tpu.memory_space<vmem>> -> memref<1x128xf32, #tpu.memory_space<vmem>>
    %87 = tpu.memref_slice %arg6[%c7_i32_60] : memref<8x!tpu.dma_semaphore, #tpu.memory_space<semaphore_mem>> -> memref<1x!tpu.dma_semaphore, #tpu.memory_space<semaphore_mem>>
    %88 = tpu.memref_squeeze %87 : memref<1x!tpu.dma_semaphore, #tpu.memory_space<semaphore_mem>> -> memref<!tpu.dma_semaphore, #tpu.memory_space<semaphore_mem>>
    tpu.wait_dma2 semaphore(%88 : memref<!tpu.dma_semaphore, #tpu.memory_space<semaphore_mem>>) src(%85 : memref<1x128xf32, #tpu.memory_space<any>>) dst(%86 : memref<1x128xf32, #tpu.memory_space<vmem>>)
    %c0 = arith.constant 0 : index
    %c0_64 = arith.constant 0 : index
    %89 = vector.load %arg5[%c0, %c0_64] : memref<8x128xf32, #tpu.memory_space<vmem>>, vector<8x128xf32>
    %c0_65 = arith.constant 0 : index
    %c0_66 = arith.constant 0 : index
    %90 = vector.load %arg2[%c0_65, %c0_66] : memref<1x128xf32, #tpu.memory_space<vmem>>, vector<1x128xf32>
    %91 = vector.broadcast %90 : vector<1x128xf32> to vector<8x128xf32>
    %92 = arith.addf %89, %91 : vector<8x128xf32>
    %c0_67 = arith.constant 0 : index
    %c0_68 = arith.constant 0 : index
    %93 = vector.load %arg4[%c0_67, %c0_68] : memref<8x128xf32, #tpu.memory_space<vmem>>, vector<8x128xf32>
    tpu.vector_store %arg4[%c0_67, %c0_68], %92 {strides = array<i32>} : memref<8x128xf32, #tpu.memory_space<vmem>>, vector<8x128xf32>,
    return
  }
  func.func @transform_0(%arg0: i32, %arg1: memref<16xi32, #tpu.memory_space<smem>>) -> (i32, i32) {
    %c0_i32 = arith.constant 0 : i32
    %c0_i32_0 = arith.constant 0 : i32
    %c0_i32_1 = arith.constant 0 : i32
    return %c0_i32, %c0_i32_0 : i32, i32
  }
  func.func @transform_2(%arg0: i32, %arg1: memref<16xi32, #tpu.memory_space<smem>>) -> (i32, i32) {
    %c0_i32 = arith.constant 0 : i32
    %c0_i32_0 = arith.constant 0 : i32
    return %arg0, %c0_i32 : i32, i32
  }
}

</mosaic_0001>

<bundles_post_ra>
// kernel: tpu_custom_call.1
= control target key start
LH: loop header
LB: loop body
LE: loop exit
PB: predicated region body
PF: predicated region fallthrough
CT: control target
= control target key end

     0   :  { %s1026_s0 = inlined_call_operand.hbm [shape: s32[16], index: 0, kind: input, shape index: {}]   ;;  %s1027_s1 = inlined_call_operand.vmem [shape: f32[1,128], index: 1, kind: input, shape index: {}]   ;;  %s1028_s2 = inlined_call_operand.hbm [shape: f32[32,128], index: 2, kind: input, shape index: {}]   ;;  %s1029_s3 = inlined_call_operand.hbm [shape: f32[16,128], index: 3, kind: output, shape index: {}]  }
   0x1   :  { %s468_s14 = scalar_lea.hbm %s1026_s0, 16 }
   0x2   :  { %p469_p0 = scmp.ne.s32.totalorder %s1026_s0, %s468_s14  ;;  %p472_p1 = scmp.lt.u32.totalorder %s468_s14, %s1026_s0 }
   0x4   :  { %p474_p2 = pnand %p472_p1, %p469_p0 }
   0x6   :  { %477 = shalt.err (!%p474_p2)  }
   0x7   :  { %s752_s19 = smov [#allocation5]  }
   0x8   :  { %9 = dma.hbm_to_smem %s1026_s0, 16, %s752_s19, [#allocation4] }
   0x9   :  { %714 = dma.done.wait [#allocation4], 16 }
   0xa   :  { %715 = vsyncadd [#allocation4], 4294967280 }
   0xb   :  { %11 = sfence }
   0xc   :  { %12 = vsyncpa [#allocation7], 0 }
   0xd   :  { %14 = vsyncpa [#allocation7 + $0x1], 0  ;;  %s794_s22 = smov 0   ;;  %s796_s23 = smov 0  }
   0xe   :  { %s798_s24 = smov 0   ;;  %s800_s25 = smov 0  }
   0xf LB: > { %1032 = sst [smem:[#allocation36_spill]] %s746_s24  ;;  %s815_s0 = sadd.s32 4294967295, %s750_s25   ;;  %s750_s25 = sphi %s800_s25, %s1041_s25   ;;  %s746_s24 = sphi %s798_s24, %s1038_s24   ;;  %s742_s23 = sphi %s796_s23, %s1040_s23   ;;  %s738_s22 = sphi %s794_s22, %s1039_s22  }
  0x10   : > { %s394_s26 = sadd.s32 4294967294, %s750_s25   ;;  %s819_s27 = sadd.s32 1, %s750_s25  }
  0x11   : > { %s48_s28 = sadd.s32 1, %s746_s24  ;;  %s45_s29 = ssub.s32 %s750_s25, %s819_s27 }
  0x12   : > { %p58_p3 = scmp.ne.s32.totalorder %s746_s24, %s742_s23  ;;  %p46_p4 = scmp.eq.s32.totalorder %s45_s29, 0 }
  0x13   : > { %p59_p5 = scmp.eq.s32.totalorder %s815_s0, 1  ;;  %p64_p6 = scmp.ne.s32.totalorder %s742_s23, %s738_s22 }
  0x14   : > { %p65_p7 = scmp.eq.s32.totalorder %s394_s26, 1  ;;  %p396_p10 = scmp.ge.s32.totalorder %s750_s25, 1 }
  0x15   : > { %s830_s30 = scalar_select %p46_p4, %s746_s24, %s48_s28  }
  0x16   : > { %p832_p8 = por %p59_p5, %p58_p3  ;;  %p836_p9 = por %p65_p7, %p64_p6 }
  0x17   : > { %1033 = sst [smem:[#allocation37_spill]] %s830_s30  ;;  %p86_p11 = scmp.lt.s32.totalorder %s750_s25, 3 }
  0x19   : > { %p87_p12 = pnand %p396_p10, %p86_p11 }
  0x1a   : > { %s1030_s6 = sand.u32 (!%p87_p12), 1, %s742_s23   ;;  %s844_s7 = sshll.u32 (!%p87_p12), %s815_s0, 3 }
  0x1b   : > { %90 = sbr.rel (%p87_p12) target bundleno = 249 (0xf9), region = 24  ;;  %s848_s8 = sshll.u32 (!%p87_p12), %s1030_s6, 3 }
  0x1c   : > { %s102_s9 = sld [smem:[#allocation5 + %s844_s7]] (!%p87_p12)  ;;  %s753_s10 = smov (!%p87_p12), [#allocation2]  }
  0x1d   : > { %s112_s11 = sshll.u32 (!%p87_p12), %s753_s10, 4  ;;  %s116_s12 = sadd.s32 (!%p87_p12), 1, %s844_s7  ;;  %s852_s11 = int_to_ptr.vmem [resolvable:$true] %s112_s11 }
  0x1e   : > { %s854_s13 = sld [smem:[#allocation5 + %s116_s12]] (!%p87_p12)  ;;  %s133_s14 = sadd.s32 (!%p87_p12), 2, %s844_s7 }
  0x1f   : > { %s754_s15 = smov (!%p87_p12), [#allocation2 + $0x1]   ;;  %s857_s17 = sld [smem:[#allocation5 + %s133_s14]] (!%p87_p12) }
  0x20   : > { %s129_s16 = sshll.u32 (!%p87_p12), %s754_s15, 4  ;;  %s867_s10 = scalar_lea.hbm (!%p87_p12), %s1028_s2, 512  ;;  %s859_s16 = int_to_ptr.vmem [resolvable:$true] %s129_s16 }
  0x22   : > { %s399_s18 = sshll.u32 %s102_s9, 4 }
  0x23   : > { %s104_s21 = scalar_lea.hbm %s1028_s2, %s399_s18 }
  0x24   : > { %s478_s26 = scalar_lea.hbm %s104_s21, 16  ;;  %p481_p0 = scmp.lt.u32.totalorder %s104_s21, %s1028_s2 }
  0x25   : > { %p479_p13 = scmp.ne.s32.totalorder %s104_s21, %s478_s26  ;;  %p482_p1 = scmp.lt.u32.totalorder %s867_s10, %s478_s26 }
  0x26   : > { %p484_p3 = scmp.lt.u32.totalorder %s478_s26, %s104_s21 }
  0x27   : > { %p483_p2 = por %p482_p1, %p481_p0 }
  0x29   : > { %p485_p4 = por %p484_p3, %p483_p2 }
  0x2b   : > { %p486_p5 = pnand %p485_p4, %p479_p13 }
  0x2d   : > { %489 = shalt.err (!%p486_p5)  }
  0x2e   : > { %s490_s9 = scalar_lea.vmem %s852_s11, 16  ;;  %s876_s14 = scalar_lea.vmem %s852_s11, 128 }
  0x2f   : > { %p491_p6 = scmp.ne.s32.totalorder %s852_s11, %s490_s9  ;;  %p495_p7 = scmp.lt.s32.totalorder %s852_s11, %s852_s11 }
  0x30   : > { %p496_p10 = scmp.lt.s32.totalorder %s876_s14, %s490_s9 }
  0x32   : > { %p497_p11 = por %p496_p10, %p495_p7 }
  0x34   : > { %p498_p12 = pnand %p497_p11, %p491_p6 }
  0x36   : > { %501 = shalt.err (!%p498_p12)  }
  0x37   : > { %115 = dma.hbm_to_vmem [thread:$0]  %s104_s21, 16, %s852_s11, [#allocation3] }
  0x38   : > { %s400_s6 = sshll.u32 %s854_s13, 4  ;;  %s755_s15 = smov [#allocation2 + $0x2]  }
  0x39   : > { %s146_s18 = sshll.u32 %s755_s15, 4  ;;  %s119_s26 = scalar_lea.hbm %s1028_s2, %s400_s6  ;;  %s886_s18 = int_to_ptr.vmem [resolvable:$true] %s146_s18 }
  0x3a   : > { %s502_s28 = scalar_lea.hbm %s119_s26, 16  ;;  %p505_p0 = scmp.lt.u32.totalorder %s119_s26, %s1028_s2 }
  0x3b   : > { %p503_p13 = scmp.ne.s32.totalorder %s119_s26, %s502_s28  ;;  %p506_p1 = scmp.lt.u32.totalorder %s867_s10, %s502_s28 }
  0x3c   : > { %p508_p3 = scmp.lt.u32.totalorder %s502_s28, %s119_s26 }
  0x3d   : > { %p507_p2 = por %p506_p1, %p505_p0 }
  0x3f   : > { %p509_p4 = por %p508_p3, %p507_p2 }
  0x41   : > { %p510_p5 = pnand %p509_p4, %p503_p13 }
  0x43   : > { %513 = shalt.err (!%p510_p5)  }
  0x44   : > { %s514_s13 = scalar_lea.vmem %s859_s16, 16  ;;  %p519_p7 = scmp.lt.s32.totalorder %s859_s16, %s852_s11 }
  0x45   : > { %p515_p6 = scmp.ne.s32.totalorder %s859_s16, %s514_s13  ;;  %p520_p10 = scmp.lt.s32.totalorder %s876_s14, %s514_s13 }
  0x47   : > { %p521_p11 = por %p520_p10, %p519_p7 }
  0x49   : > { %p522_p12 = pnand %p521_p11, %p515_p6 }
  0x4b   : > { %525 = shalt.err (!%p522_p12)  }
  0x4c   : > { %132 = dma.hbm_to_vmem [thread:$0]  %s119_s26, 16, %s859_s16, [#allocation3 + $0x1] }
  0x4d   : > { %s401_s21 = sshll.u32 %s857_s17, 4  ;;  %s150_s9 = sadd.s32 3, %s844_s7 }
  0x4e   : > { %s136_s19 = scalar_lea.hbm %s1028_s2, %s401_s21  ;;  %s903_s20 = sld [smem:[#allocation5 + %s150_s9]] }
  0x4f   : > { %s526_s28 = scalar_lea.hbm %s136_s19, 16  ;;  %p529_p0 = scmp.lt.u32.totalorder %s136_s19, %s1028_s2 }
  0x50   : > { %p527_p13 = scmp.ne.s32.totalorder %s136_s19, %s526_s28  ;;  %p530_p1 = scmp.lt.u32.totalorder %s867_s10, %s526_s28 }
  0x51   : > { %p532_p3 = scmp.lt.u32.totalorder %s526_s28, %s136_s19 }
  0x52   : > { %p531_p2 = por %p530_p1, %p529_p0 }
  0x54   : > { %p533_p4 = por %p532_p3, %p531_p2 }
  0x56   : > { %p534_p5 = pnand %p533_p4, %p527_p13 }
  0x58   : > { %537 = shalt.err (!%p534_p5)  }
  0x59   : > { %s538_s16 = scalar_lea.vmem %s886_s18, 16  ;;  %p543_p7 = scmp.lt.s32.totalorder %s886_s18, %s852_s11 }
  0x5a   : > { %p539_p6 = scmp.ne.s32.totalorder %s886_s18, %s538_s16  ;;  %p544_p10 = scmp.lt.s32.totalorder %s876_s14, %s538_s16 }
  0x5c   : > { %p545_p11 = por %p544_p10, %p543_p7 }
  0x5e   : > { %p546_p12 = pnand %p545_p11, %p539_p6 }
  0x60   : > { %549 = shalt.err (!%p546_p12)  }
  0x61   : > { %149 = dma.hbm_to_vmem [thread:$0]  %s136_s19, 16, %s886_s18, [#allocation3 + $0x2] }
  0x62   : > { %s167_s17 = sadd.s32 4, %s844_s7  ;;  %s756_s26 = smov [#allocation2 + $0x3]  }
  0x63   : > { %s163_s13 = sshll.u32 %s756_s26, 4  ;;  %s168_s21 = sld [smem:[#allocation5 + %s167_s17]]  ;;  %s164_s13 = int_to_ptr.vmem [resolvable:$true] %s163_s13 }
  0x64   : > { %s757_s9 = smov [#allocation2 + $0x4]   ;;  %s184_s15 = sadd.s32 5, %s844_s7 }
  0x65   : > { %s180_s6 = sshll.u32 %s757_s9, 4  ;;  %s402_s28 = sshll.u32 %s903_s20, 4  ;;  %s918_s6 = int_to_ptr.vmem [resolvable:$true] %s180_s6 }
  0x66   : > { %s153_s16 = scalar_lea.hbm %s1028_s2, %s402_s28  ;;  %s923_s30 = sld [smem:[#allocation5 + %s184_s15]] }
  0x67   : > { %s550_s24 = scalar_lea.hbm %s153_s16, 16  ;;  %p553_p0 = scmp.lt.u32.totalorder %s153_s16, %s1028_s2 }
  0x68   : > { %p551_p13 = scmp.ne.s32.totalorder %s153_s16, %s550_s24  ;;  %p554_p1 = scmp.lt.u32.totalorder %s867_s10, %s550_s24 }
  0x69   : > { %p556_p3 = scmp.lt.u32.totalorder %s550_s24, %s153_s16 }
  0x6a   : > { %p555_p2 = por %p554_p1, %p553_p0 }
  0x6c   : > { %p557_p4 = por %p556_p3, %p555_p2 }
  0x6e   : > { %p558_p5 = pnand %p557_p4, %p551_p13 }
  0x70   : > { %561 = shalt.err (!%p558_p5)  }
  0x71   : > { %s562_s20 = scalar_lea.vmem %s164_s13, 16  ;;  %p567_p7 = scmp.lt.s32.totalorder %s164_s13, %s852_s11 }
  0x72   : > { %p563_p6 = scmp.ne.s32.totalorder %s164_s13, %s562_s20  ;;  %p568_p10 = scmp.lt.s32.totalorder %s876_s14, %s562_s20 }
  0x74   : > { %p569_p11 = por %p568_p10, %p567_p7 }
  0x76   : > { %p570_p12 = pnand %p569_p11, %p563_p6 }
  0x78   : > { %573 = shalt.err (!%p570_p12)  }
  0x79   : > { %166 = dma.hbm_to_vmem [thread:$0]  %s153_s16, 16, %s164_s13, [#allocation3 + $0x3] }
  0x7a   : > { %s403_s17 = sshll.u32 %s168_s21, 4  ;;  %s758_s24 = smov [#allocation2 + $0x5]  }
  0x7b   : > { %s170_s15 = scalar_lea.hbm %s1028_s2, %s403_s17  ;;  %s197_s28 = sshll.u32 %s758_s24, 4  ;;  %s198_s28 = int_to_ptr.vmem [resolvable:$true] %s197_s28 }
  0x7c   : > { %s574_s29 = scalar_lea.hbm %s170_s15, 16  ;;  %p577_p0 = scmp.lt.u32.totalorder %s170_s15, %s1028_s2 }
  0x7d   : > { %p575_p13 = scmp.ne.s32.totalorder %s170_s15, %s574_s29  ;;  %p578_p1 = scmp.lt.u32.totalorder %s867_s10, %s574_s29 }
  0x7e   : > { %p580_p3 = scmp.lt.u32.totalorder %s574_s29, %s170_s15 }
  0x7f   : > { %p579_p2 = por %p578_p1, %p577_p0 }
  0x81   : > { %p581_p4 = por %p580_p3, %p579_p2 }
  0x83   : > { %p582_p5 = pnand %p581_p4, %p575_p13 }
  0x85   : > { %585 = shalt.err (!%p582_p5)  }
  0x86   : > { %s586_s13 = scalar_lea.vmem %s918_s6, 16  ;;  %p591_p7 = scmp.lt.s32.totalorder %s918_s6, %s852_s11 }
  0x87   : > { %p587_p6 = scmp.ne.s32.totalorder %s918_s6, %s586_s13  ;;  %p592_p10 = scmp.lt.s32.totalorder %s876_s14, %s586_s13 }
  0x89   : > { %p593_p11 = por %p592_p10, %p591_p7 }
  0x8b   : > { %p594_p12 = pnand %p593_p11, %p587_p6 }
  0x8d   : > { %597 = shalt.err (!%p594_p12)  }
  0x8e   : > { %183 = dma.hbm_to_vmem [thread:$0]  %s170_s15, 16, %s918_s6, [#allocation3 + $0x4] }
  0x8f   : > { %s201_s21 = sadd.s32 6, %s844_s7  ;;  %s404_s16 = sshll.u32 %s923_s30, 4 }
  0x90   : > { %s202_s19 = sld [smem:[#allocation5 + %s201_s21]]  ;;  %s187_s26 = scalar_lea.hbm %s1028_s2, %s404_s16 }
  0x91   : > { %s598_s9 = scalar_lea.hbm %s187_s26, 16  ;;  %p601_p0 = scmp.lt.u32.totalorder %s187_s26, %s1028_s2 }
  0x92   : > { %p599_p13 = scmp.ne.s32.totalorder %s187_s26, %s598_s9  ;;  %p602_p1 = scmp.lt.u32.totalorder %s867_s10, %s598_s9 }
  0x93   : > { %p604_p3 = scmp.lt.u32.totalorder %s598_s9, %s187_s26 }
  0x94   : > { %p603_p2 = por %p602_p1, %p601_p0 }
  0x96   : > { %p605_p4 = por %p604_p3, %p603_p2 }
  0x98   : > { %p606_p5 = pnand %p605_p4, %p599_p13 }
  0x9a   : > { %609 = shalt.err (!%p606_p5)  }
  0x9b   : > { %s610_s6 = scalar_lea.vmem %s198_s28, 16  ;;  %p615_p7 = scmp.lt.s32.totalorder %s198_s28, %s852_s11 }
  0x9c   : > { %p611_p6 = scmp.ne.s32.totalorder %s198_s28, %s610_s6  ;;  %p616_p10 = scmp.lt.s32.totalorder %s876_s14, %s610_s6 }
  0x9e   : > { %p617_p11 = por %p616_p10, %p615_p7 }
  0xa0   : > { %p618_p12 = pnand %p617_p11, %p611_p6 }
  0xa2   : > { %621 = shalt.err (!%p618_p12)  }
  0xa3   : > { %200 = dma.hbm_to_vmem [thread:$0]  %s187_s26, 16, %s198_s28, [#allocation3 + $0x5] }
  0xa4   : > { %s759_s30 = smov [#allocation2 + $0x6]   ;;  %s218_s12 = sadd.s32 7, %s844_s7 }
  0xa5   : > { %s214_s15 = sshll.u32 %s759_s30, 4  ;;  %s219_s18 = sld [smem:[#allocation5 + %s218_s12]]  ;;  %s215_s15 = int_to_ptr.vmem [resolvable:$true] %s214_s15 }
  0xa6   : > { %s405_s13 = sshll.u32 %s202_s19, 4  ;;  %s760_s21 = smov [#allocation2 + $0x7]  }
  0xa7   : > { %s231_s16 = sshll.u32 %s760_s21, 4  ;;  %s204_s9 = scalar_lea.hbm %s1028_s2, %s405_s13  ;;  %s232_s16 = int_to_ptr.vmem [resolvable:$true] %s231_s16 }
  0xa8   : > { %s622_s24 = scalar_lea.hbm %s204_s9, 16  ;;  %p625_p0 = scmp.lt.u32.totalorder %s204_s9, %s1028_s2 }
  0xa9   : > { %p623_p13 = scmp.ne.s32.totalorder %s204_s9, %s622_s24  ;;  %p626_p1 = scmp.lt.u32.totalorder %s867_s10, %s622_s24 }
  0xaa   : > { %p628_p3 = scmp.lt.u32.totalorder %s622_s24, %s204_s9 }
  0xab   : > { %p627_p2 = por %p626_p1, %p625_p0 }
  0xad   : > { %p629_p4 = por %p628_p3, %p627_p2 }
  0xaf   : > { %p630_p5 = pnand %p629_p4, %p623_p13 }
  0xb1   : > { %633 = shalt.err (!%p630_p5)  }
  0xb2   : > { %s634_s7 = scalar_lea.vmem %s215_s15, 16  ;;  %p639_p7 = scmp.lt.s32.totalorder %s215_s15, %s852_s11 }
  0xb3   : > { %p635_p6 = scmp.ne.s32.totalorder %s215_s15, %s634_s7  ;;  %p640_p10 = scmp.lt.s32.totalorder %s876_s14, %s634_s7 }
  0xb5   : > { %p641_p11 = por %p640_p10, %p639_p7 }
  0xb7   : > { %p642_p12 = pnand %p641_p11, %p635_p6 }
  0xb9   : > { %645 = shalt.err (!%p642_p12)  }
  0xba   : > { %217 = dma.hbm_to_vmem [thread:$0]  %s204_s9, 16, %s215_s15, [#allocation3 + $0x6] }
  0xbb   : > { %s406_s28 = sshll.u32 %s219_s18, 4 }
  0xbc   : > { %s221_s30 = scalar_lea.hbm %s1028_s2, %s406_s28 }
  0xbd   : > { %s646_s12 = scalar_lea.hbm %s221_s30, 16  ;;  %p649_p0 = scmp.lt.u32.totalorder %s221_s30, %s1028_s2 }
  0xbe   : > { %p647_p13 = scmp.ne.s32.totalorder %s221_s30, %s646_s12  ;;  %p650_p1 = scmp.lt.u32.totalorder %s867_s10, %s646_s12 }
  0xbf   : > { %p652_p3 = scmp.lt.u32.totalorder %s646_s12, %s221_s30 }
  0xc0   : > { %p651_p2 = por %p650_p1, %p649_p0 }
  0xc2   : > { %p653_p4 = por %p652_p3, %p651_p2 }
  0xc4   : > { %p654_p5 = pnand %p653_p4, %p647_p13 }
  0xc6   : > { %657 = shalt.err (!%p654_p5)  }
  0xc7   : > { %s658_s15 = scalar_lea.vmem %s232_s16, 16  ;;  %p663_p7 = scmp.lt.s32.totalorder %s232_s16, %s852_s11 }
  0xc8   : > { %p659_p6 = scmp.ne.s32.totalorder %s232_s16, %s658_s15  ;;  %p664_p10 = scmp.lt.s32.totalorder %s876_s14, %s658_s15 }
  0xca   : > { %p665_p11 = por %p664_p10, %p663_p7 }
  0xcc   : > { %p666_p12 = pnand %p665_p11, %p659_p6 }
  0xce   : > { %669 = shalt.err (!%p666_p12)  }
  0xcf   : > { %234 = dma.hbm_to_vmem [thread:$0]  %s221_s30, 16, %s232_s16, [#allocation3 + $0x7] }
  0xd0   : > { %s100_s18 = scalar_lea.vmem [#allocation6], %s848_s8 }
  0xd1   : > { %716 = dma.done.wait [#allocation3], 16 }
  0xd2   : > { %717 = vsyncadd [#allocation3], 4294967280 }
  0xd3   : > { %718 = dma.done.wait [#allocation3 + $0x1], 16 }
  0xd4   : > { %719 = vsyncadd [#allocation3 + $0x1], 4294967280 }
  0xd5   : > { %720 = dma.done.wait [#allocation3 + $0x2], 16 }
  0xd6   : > { %721 = vsyncadd [#allocation3 + $0x2], 4294967280 }
  0xd7   : > { %722 = dma.done.wait [#allocation3 + $0x3], 16 }
  0xd8   : > { %723 = vsyncadd [#allocation3 + $0x3], 4294967280 }
  0xd9   : > { %724 = dma.done.wait [#allocation3 + $0x4], 16 }
  0xda   : > { %725 = vsyncadd [#allocation3 + $0x4], 4294967280 }
  0xdb   : > { %726 = dma.done.wait [#allocation3 + $0x5], 16 }
  0xdc   : > { %727 = vsyncadd [#allocation3 + $0x5], 4294967280 }
  0xdd   : > { %728 = dma.done.wait [#allocation3 + $0x6], 16 }
  0xde   : > { %729 = vsyncadd [#allocation3 + $0x6], 4294967280 }
  0xdf   : > { %730 = dma.done.wait [#allocation3 + $0x7], 16 }
  0xe0   : > { %731 = vsyncadd [#allocation3 + $0x7], 4294967280  ;;  %s409_s8 = sshll.u32 %s815_s0, 7  ;;  %s276_s11 = sshll.u32 %s100_s18, 4  ;;  %v252_v0 = vld [vmem:[#allocation2] sm:$0xff]  ;;  %s984_s11 = int_to_ptr.vmem [resolvable:$true] %s276_s11 }
  0xe1   : > { %v407_v1 = vld [vmem:[%s1027_s1] ss:$0 sm:$0xff]  ;;  %s982_s17 = scalar_lea.hbm %s1029_s3, %s409_s8  ;;  %s1036_s9 = sand.u32 1, %s742_s23  }
  0xe2   : > { %v260_v2 = vadd.f32 %v407_v1, %v252_v0  ;;  %s263_s0 = scalar_lea.sflag [#allocation7], %s1036_s9  ;;  %s670_s24 = scalar_lea.vmem %s984_s11, 128 }
  0xe3   : > { %p671_p13 = scmp.ne.s32.totalorder %s984_s11, %s670_s24  ;;  %s761_s29 = smov [#allocation6]  }
  0xe4   : > { %261 = vst [vmem:[%s100_s18] sm:$0xff] %v260_v2  ;;  %s674_s6 = sshll.u32 %s761_s29, 4  ;;  %s675_s6 = int_to_ptr.vmem [resolvable:$false] %s674_s6 }
  0xe5   : > { %p672_p0 = pnand %p671_p13, %p832_p8  ;;  %s676_s7 = scalar_lea.vmem %s675_s6, 256 }
  0xe6   : > { %p677_p2 = scmp.lt.s32.totalorder %s984_s11, %s675_s6  ;;  %p678_p3 = scmp.lt.s32.totalorder %s676_s7, %s670_s24 }
  0xe7   : > { %p673_p1 = pneg %p672_p0 }
  0xe8   : > { %p679_p4 = por %p678_p3, %p677_p2 }
  0xea   : > { %p680_p5 = pnand %p679_p4, %p673_p1 }
  0xec   : > { %683 = shalt.err (!%p680_p5)
}
  0xed   : > { %s684_s28 = scalar_lea.hbm %s982_s17, 128  ;;  %s688_s30 = scalar_lea.hbm %s1029_s3, 256 }
  0xee   : > { %p685_p6 = scmp.ne.s32.totalorder %s982_s17, %s684_s28  ;;  %p689_p11 = scmp.lt.u32.totalorder %s982_s17, %s1029_s3 }
  0xef   : > { %p690_p12 = scmp.lt.u32.totalorder %s688_s30, %s684_s28  ;;  %p692_p0 = scmp.lt.u32.totalorder %s684_s28, %s982_s17 }
  0xf0   : > { %p686_p7 = pnand %p685_p6, %p832_p8 }
  0xf1   : > { %p691_p13 = por %p690_p12, %p689_p11 }
  0xf2   : > { %p687_p10 = pneg %p686_p7 }
  0xf3   : > { %p693_p1 = por %p692_p0, %p691_p13 }
  0xf5   : > { %p694_p2 = pnand %p693_p1, %p687_p10 }
  0xf7   : > { %697 = shalt.err (!%p694_p2)
}
  0xf8   : > { %420 = dma.vmem_to_hbm [thread:$0]  (%p832_p8), %s984_s11, 128, %s982_s17, %s263_s0  }
  0xf9 PF: > { %p426_p3 = scmp.ge.s32.totalorder %s750_s25, 2  ;;  %s288_s21 = sand.u32 1, %s738_s22  }
  0xfa   : > { %s289_s15 = scalar_lea.sflag [#allocation7], %s288_s21 }
  0xfb   : > { %p423_p4 = pnand %p426_p3, %p836_p9 }
  0xfd   : > { %733 = dma.done.wait (!%p423_p4), %s289_s15, 128  }
  0xfe   : > { %735 = vsyncadd (!%p423_p4), %s289_s15, 4294967168  ;;  %s1037_s18 = sld [smem:[#allocation36_spill]]  ;;  %s1038_s24 = sld [smem:[#allocation37_spill]] }
  0xff   : > { %p17_p5 = scmp.ge.s32.totalorder %s819_s27, 4   ;;  %s1039_s22 = smov %s742_s23 }
 0x100   : > { %s1041_s25 = smov %s819_s27 }
 0x101   :  { %19 = sbr.rel (!%p17_p5) target bundleno = 15 (0xf), region = 117 }
 0x104   : > { %s1040_s23 = smov %s1037_s18 }
 0x108   :  { %294 = vsyncpa [#allocation7], 1 }
 0x109   :  { %296 = vsyncpa [#allocation7 + $0x1], 1 }
 0x10a   :  { %297 = vsyncmov [#allocation3] }
 0x10d   :  { %s298_s25 = vpop.sfrf %297 }
 0x10e   :  { %p412_p8 = scmp.ne.s32.totalorder %s298_s25, 0 }
 0x110   :  { %302 = shalt.err (%p412_p8)  }
 0x111   :  { %304 = vsyncmov [#allocation3 + $0x1] }
 0x114   :  { %s305_s4 = vpop.sfrf %304 }
 0x115   :  { %p413_p9 = scmp.ne.s32.totalorder %s305_s4, 0 }
 0x117   :  { %309 = shalt.err (%p413_p9)  }
 0x118   :  { %311 = vsyncmov [#allocation3 + $0x2] }
 0x11b   :  { %s312_s5 = vpop.sfrf %311 }
 0x11c   :  { %p414_p6 = scmp.ne.s32.totalorder %s312_s5, 0 }
 0x11e   :  { %316 = shalt.err (%p414_p6)  }
 0x11f   :  { %318 = vsyncmov [#allocation3 + $0x3] }
 0x122   :  { %s319_s8 = vpop.sfrf %318 }
 0x123   :  { %p415_p7 = scmp.ne.s32.totalorder %s319_s8, 0 }
 0x125   :  { %323 = shalt.err (%p415_p7)  }
 0x126   :  { %325 = vsyncmov [#allocation3 + $0x4] }
 0x129   :  { %s326_s27 = vpop.sfrf %325 }
 0x12a   :  { %p416_p10 = scmp.ne.s32.totalorder %s326_s27, 0 }
 0x12c   :  { %330 = shalt.err (%p416_p10)  }
 0x12d   :  { %332 = vsyncmov [#allocation3 + $0x5] }
 0x130   :  { %s333_s1 = vpop.sfrf %332 }
 0x131   :  { %p417_p11 = scmp.ne.s32.totalorder %s333_s1, 0 }
 0x133   :  { %337 = shalt.err (%p417_p11)  }
 0x134   :  { %339 = vsyncmov [#allocation3 + $0x6] }
 0x137   :  { %s340_s2 = vpop.sfrf %339 }
 0x138   :  { %p418_p12 = scmp.ne.s32.totalorder %s340_s2, 0 }
 0x13a   :  { %344 = shalt.err (%p418_p12)  }
 0x13b   :  { %346 = vsyncmov [#allocation3 + $0x7] }
 0x13e   :  { %s347_s3 = vpop.sfrf %346 }
 0x13f   :  { %p419_p13 = scmp.ne.s32.totalorder %s347_s3, 0 }
 0x141   :  { %351 = shalt.err (%p419_p13)  }

</bundles_post_ra>
